<compile_context>
chip_gen: v5e
topology: v5e:2x2
jax: 0.10.0
libtpu: 0.0.40
codegen_flags: <defaults>
</compile_context>

<pallas_src>
import numpy as np
import jax
import jax.numpy as jnp
from jax.experimental import pallas as pl
from jax.experimental.pallas import tpu as pltpu


# ----------------------------------------------------------------------------
# Pallas kernel
# ----------------------------------------------------------------------------
def _wavelet_pool_kernel(x_ref, t_ref, o_ref):
    # x_ref: (1, TR, 2*W)   row = (c, h_out); lanes = [even input row | odd input row]
    # t_ref: (2*W, 4*Wo)    constant Haar combination matrix
    # o_ref: (1, 4, TR, Wo) subbands LL, HL, LH, HH
    y = jnp.dot(
        x_ref[0],
        t_ref[...],
        preferred_element_type=jnp.float32,
        precision=jax.lax.Precision.HIGHEST,
    )  # (TR, 4*Wo)
    wo = o_ref.shape[-1]
    for s in range(4):  # LL, HL, LH, HH — static lane-contiguous slices
        o_ref[0, s, :, :] = y[:, s * wo:(s + 1) * wo].astype(o_ref.dtype)


# ----------------------------------------------------------------------------
# Constant Haar matrix (built once at trace time)
# ----------------------------------------------------------------------------
def _haar_matrix(w):
    """(2W, 4*Wo) matrix T so that [E_row | O_row] @ T = [LL | HL | LH | HH]."""
    wo = w // 2
    t = np.zeros((2 * w, 4 * wo), np.float32)
    #            x00  x01  x10  x11   (x00=even row/even col, x01=even/odd,
    #                                  x10=odd/even,          x11=odd/odd)
    coeffs = [( 1,  1,  1,  1),   # LL
              (-1,  1, -1,  1),   # HL
              (-1, -1,  1,  1),   # LH
              ( 1, -1, -1,  1)]   # HH
    for s, (c00, c01, c10, c11) in enumerate(coeffs):
        for j in range(wo):
            t[2 * j,         s * wo + j] = 0.5 * c00
            t[2 * j + 1,     s * wo + j] = 0.5 * c01
            t[w + 2 * j,     s * wo + j] = 0.5 * c10
            t[w + 2 * j + 1, s * wo + j] = 0.5 * c11
    return t


def _pick_row_tile(rows, max_rows=512):
    """Largest sublane-aligned divisor of `rows` (<= max_rows), else full rows."""
    if rows <= max_rows:
        return rows
    best = 0
    for cand in range(8, max_rows + 1, 8):
        if rows % cand == 0:
            best = cand
    if best:
        return best
    # TODO(synk): masked remainder tile for row counts with no aligned divisor.
    return rows


# ----------------------------------------------------------------------------
# Wrapper
# ----------------------------------------------------------------------------
@jax.jit
def wavelet_pool(x):
    n, c, h, w = x.shape
    assert h % 2 == 0 and w % 2 == 0, "WaveletPool requires even spatial dims"
    ho, wo = h // 2, w // 2
    rows = c * ho
    tr = _pick_row_tile(rows)

    x2 = x.reshape(n, rows, 2 * w)                 # free reshape (no transpose)
    t = jnp.asarray(_haar_matrix(w))               # (2W, 4*Wo) constant

    out = pl.pallas_call(
        _wavelet_pool_kernel,
        out_shape=jax.ShapeDtypeStruct((n, 4, rows, wo), x.dtype),
        grid_spec=pltpu.PrefetchScalarGridSpec(
            num_scalar_prefetch=0,
            grid=(n, rows // tr),
            in_specs=[
                pl.BlockSpec((1, tr, 2 * w), lambda i, r: (i, r, 0)),
                pl.BlockSpec((2 * w, 4 * wo), lambda i, r: (0, 0)),
            ],
            out_specs=pl.BlockSpec((1, 4, tr, wo), lambda i, r: (i, 0, r, 0)),
        ),
        compiler_params=pltpu.CompilerParams(
            dimension_semantics=("parallel", "parallel")),
    )(x2, t)

    # (N, 4, C*Ho, Wo) -> (N, 4C, Ho, Wo): identical memory order as
    # torch.cat((LL, HL, LH, HH), dim=1) — free reshape.
    return out.reshape(n, 4 * c, ho, wo)


# ----------------------------------------------------------------------------
# Pure-JAX reference (mirrors the PyTorch module exactly)
# ----------------------------------------------------------------------------
def _reference(x):
    even = x[:, :, ::2, :] / 2
    odd = x[:, :, 1::2, :] / 2
    x00 = even[:, :, :, ::2]
    x10 = odd[:, :, :, ::2]
    x01 = even[:, :, :, 1::2]
    x11 = odd[:, :, :, 1::2]
    ll = x00 + x10 + x01 + x11
    hl = -x00 - x10 + x01 + x11
    lh = -x00 + x10 - x01 + x11
    hh = x00 - x10 - x01 + x11
    return jnp.concatenate((ll, hl, lh, hh), axis=1)


if __name__ == "__main__":
    key = jax.random.PRNGKey(0)
    n, c, h, w = 2, 4, 16, 16
    x = jax.random.normal(key, (n, c, h, w), jnp.float32)

    out = wavelet_pool(x)
    out = jax.block_until_ready(out)

    ref = _reference(x)
    assert out.shape == (n, 4 * c, h // 2, w // 2), out.shape
    max_err = float(jnp.max(jnp.abs(out - ref)))
    assert jnp.allclose(out, ref, atol=1e-4, rtol=1e-4), max_err

    print("KERNEL_OK")
</pallas_src>

<mosaic_0001>
module attributes {stable_mosaic.version = 11 : i64} {
  func.func @_wavelet_pool_kernel(%arg0: i32, %arg1: i32, %arg2: memref<1x32x32xf32, #tpu.memory_space<vmem>>, %arg3: memref<32x32xf32, #tpu.memory_space<vmem>>, %arg4: memref<1x4x32x8xf32, #tpu.memory_space<vmem>>) attributes {dimension_semantics = [#tpu.dimension_semantics<parallel>, #tpu.dimension_semantics<parallel>], iteration_bounds = array<i64: 2, 1>, scalar_prefetch = 0 : i64, scratch_operands = 0 : i64, tpu.core_type = #tpu.core_type<tc>, window_params = [{transform_indices = @transform_0, window_bounds = array<i64: 1, 32, 32>}, {pipeline_mode = #tpu.pipeline_mode<synchronous>, transform_indices = @transform_1, window_bounds = array<i64: 32, 32>}, {transform_indices = @transform_2, window_bounds = array<i64: 1, 4, 32, 8>}]} {
    %c0 = arith.constant 0 : index
    %c0_0 = arith.constant 0 : index
    %c0_1 = arith.constant 0 : index
    %0 = vector.load %arg2[%c0, %c0_0, %c0_1] : memref<1x32x32xf32, #tpu.memory_space<vmem>>, vector<1x32x32xf32>
    %1 = vector.shape_cast %0 : vector<1x32x32xf32> to vector<32x32xf32>
    %c0_2 = arith.constant 0 : index
    %c0_3 = arith.constant 0 : index
    %2 = vector.load %arg3[%c0_2, %c0_3] : memref<32x32xf32, #tpu.memory_space<vmem>>, vector<32x32xf32>
    %cst = arith.constant dense<0.000000e+00> : vector<32x32xf32>
    %3 = tpu.matmul %1, %2, %cst {dimension_numbers = #tpu.dot_dimension_numbers<[1], [0], [0], [1], [0, 0, 1, 1], [], []>, precision = #tpu.contract_precision<fp32>} : vector<32x32xf32>, vector<32x32xf32>, vector<32x32xf32> -> vector<32x32xf32>
    %4 = vector.extract_strided_slice %3 {offsets = [0, 0], sizes = [32, 8], strides = [1, 1]} : vector<32x32xf32> to vector<32x8xf32>
    %c0_4 = arith.constant 0 : index
    %c0_5 = arith.constant 0 : index
    %c0_6 = arith.constant 0 : index
    %c0_7 = arith.constant 0 : index
    %5 = vector.load %arg4[%c0_4, %c0_5, %c0_6, %c0_7] : memref<1x4x32x8xf32, #tpu.memory_space<vmem>>, vector<1x1x32x8xf32>
    %6 = vector.shape_cast %5 : vector<1x1x32x8xf32> to vector<32x8xf32>
    %7 = vector.shape_cast %4 : vector<32x8xf32> to vector<1x1x32x8xf32>
    tpu.vector_store %arg4[%c0_4, %c0_5, %c0_6, %c0_7], %7 {strides = array<i32>} : memref<1x4x32x8xf32, #tpu.memory_space<vmem>>, vector<1x1x32x8xf32>,
    %8 = vector.extract_strided_slice %3 {offsets = [0, 8], sizes = [32, 8], strides = [1, 1]} : vector<32x32xf32> to vector<32x8xf32>
    %c0_8 = arith.constant 0 : index
    %c1 = arith.constant 1 : index
    %c0_9 = arith.constant 0 : index
    %c0_10 = arith.constant 0 : index
    %9 = vector.load %arg4[%c0_8, %c1, %c0_9, %c0_10] : memref<1x4x32x8xf32, #tpu.memory_space<vmem>>, vector<1x1x32x8xf32>
    %10 = vector.shape_cast %9 : vector<1x1x32x8xf32> to vector<32x8xf32>
    %11 = vector.shape_cast %8 : vector<32x8xf32> to vector<1x1x32x8xf32>
    tpu.vector_store %arg4[%c0_8, %c1, %c0_9, %c0_10], %11 {strides = array<i32>} : memref<1x4x32x8xf32, #tpu.memory_space<vmem>>, vector<1x1x32x8xf32>,
    %12 = vector.extract_strided_slice %3 {offsets = [0, 16], sizes = [32, 8], strides = [1, 1]} : vector<32x32xf32> to vector<32x8xf32>
    %c0_11 = arith.constant 0 : index
    %c2 = arith.constant 2 : index
    %c0_12 = arith.constant 0 : index
    %c0_13 = arith.constant 0 : index
    %13 = vector.load %arg4[%c0_11, %c2, %c0_12, %c0_13] : memref<1x4x32x8xf32, #tpu.memory_space<vmem>>, vector<1x1x32x8xf32>
    %14 = vector.shape_cast %13 : vector<1x1x32x8xf32> to vector<32x8xf32>
    %15 = vector.shape_cast %12 : vector<32x8xf32> to vector<1x1x32x8xf32>
    tpu.vector_store %arg4[%c0_11, %c2, %c0_12, %c0_13], %15 {strides = array<i32>} : memref<1x4x32x8xf32, #tpu.memory_space<vmem>>, vector<1x1x32x8xf32>,
    %16 = vector.extract_strided_slice %3 {offsets = [0, 24], sizes = [32, 8], strides = [1, 1]} : vector<32x32xf32> to vector<32x8xf32>
    %c0_14 = arith.constant 0 : index
    %c3 = arith.constant 3 : index
    %c0_15 = arith.constant 0 : index
    %c0_16 = arith.constant 0 : index
    %17 = vector.load %arg4[%c0_14, %c3, %c0_15, %c0_16] : memref<1x4x32x8xf32, #tpu.memory_space<vmem>>, vector<1x1x32x8xf32>
    %18 = vector.shape_cast %17 : vector<1x1x32x8xf32> to vector<32x8xf32>
    %19 = vector.shape_cast %16 : vector<32x8xf32> to vector<1x1x32x8xf32>
    tpu.vector_store %arg4[%c0_14, %c3, %c0_15, %c0_16], %19 {strides = array<i32>} : memref<1x4x32x8xf32, #tpu.memory_space<vmem>>, vector<1x1x32x8xf32>,
    return
  }
  func.func @transform_0(%arg0: i32, %arg1: i32) -> (i32, i32, i32) {
    %c0_i32 = arith.constant 0 : i32
    %c0_i32_0 = arith.constant 0 : i32
    return %arg0, %arg1, %c0_i32 : i32, i32, i32
  }
  func.func @transform_1(%arg0: i32, %arg1: i32) -> (i32, i32) {
    %c0_i32 = arith.constant 0 : i32
    %c0_i32_0 = arith.constant 0 : i32
    %c0_i32_1 = arith.constant 0 : i32
    return %c0_i32, %c0_i32_0 : i32, i32
  }
  func.func @transform_2(%arg0: i32, %arg1: i32) -> (i32, i32, i32, i32) {
    %c0_i32 = arith.constant 0 : i32
    %c0_i32_0 = arith.constant 0 : i32
    %c0_i32_1 = arith.constant 0 : i32
    return %arg0, %c0_i32, %arg1, %c0_i32_0 : i32, i32, i32, i32
  }
}

</mosaic_0001>

<bundles_post_ra>
// kernel: wavelet_pool.1
= control target key start
LH: loop header
LB: loop body
LE: loop exit
PB: predicated region body
PF: predicated region fallthrough
CT: control target
= control target key end

     0   :  { %s731_s9 = smov 0   ;;  %s733_s10 = smov 0   ;;  %s866_s0 = inlined_call_operand.vmem [shape: f32[2,32,32], index: 0, kind: input, shape index: {}]   ;;  %s867_s1 = inlined_call_operand.vmem [shape: f32[32,32], index: 1, kind: input, shape index: {}]   ;;  %s868_s2 = inlined_call_operand.vmem [shape: f32[2,4,32,8], index: 2, kind: output, shape index: {}]  }
   0x1   :  { %s735_s11 = smov 0  }
   0x2 LB: > { %s24_s12 = sadd.s32 1, %s707_s10  ;;  %p633_p0 = scmp.ge.s32.totalorder %s711_s11, 1  ;;  %s711_s11 = sphi %s735_s11, %s12_s11   ;;  %s707_s10 = sphi %s733_s10, %s870_s10   ;;  %s703_s9 = sphi %s731_s9, %s869_s9  }
   0x3   : > { %p26_p1 = scmp.ge.s32.totalorder %s24_s12, 2  ;;  %p133_p2 = scmp.lt.s32.totalorder %s711_s11, 3 }
   0x5   : > { %s872_s12 = smov (%p26_p1, %s24_s12), 0  ;;  %p134_p3 = pnand %p633_p0, %p133_p2 }
   0x6   : > { %p164_p4 = scmp.lt.s32.totalorder (!%p134_p3), %s703_s9, 1  ;;  %s713_s29 = smov (!%p134_p3), 112  }
   0x7   : > { %137 = sbr.rel (%p134_p3) target bundleno = 343 (0x157), region = 28  ;;  %s714_s30 = smov (!%p134_p3), 120  }
   0x8   : > { %s715_s3 = smov (!%p134_p3), 104  }
   0xc   : > { %v190_v0 = vld [vmem:[%s867_s1 + $0x18] sm:$0xff]  ;;  %v189_v1 = vld [vmem:[%s867_s1 + $0x10] sm:$0xff]  ;;  %v188_v2 = vld [vmem:[%s867_s1 + $0x8] sm:$0xff]  ;;  %s874_s9 = smov (!%p164_p4, %s703_s9), 1  ;;  %vm191_vm0 = vcmask 261120   ;;  %vm482_vm1 = vcmask 64512  }
   0xd   : > { %v758_v3 = vand.u32 4294901760, %v190_v0  ;;  %v760_v4 = vand.u32 4294901760, %v189_v1  ;;  %v762_v5 = vand.u32 4294901760, %v188_v2  ;;  %v187_v6 = vld [vmem:[%s867_s1] sm:$0xff]  ;;  %s652_s21 = sshll.u32 %s874_s9, 5  ;;  %s653_s25 = sshll.u32 %s874_s9, 7 }
   0xe   : > { %v767_v7 = vand.u32 4294901760, %v187_v6  ;;  %s171_s24 = scalar_lea.vmem %s866_s0, %s652_s21  ;;  %s815_s28 = scalar_lea.vmem %s868_s2, %s653_s25 }
   0xf   : > { %654 = vmatpush.msra.mxu2 %v758_v3  ;;  %v270_v8 = vsub.f32 %v190_v0, %v758_v3  ;;  %v276_v9 = vsub.f32 %v189_v1, %v760_v4  ;;  %v282_v10 = vsub.f32 %v188_v2, %v762_v5  ;;  %217 = vmatpush.msra.mxu0 %v758_v3  ;;  %v185_v16 = vld [vmem:[%s171_s24 + $0x10] sm:$0xff]  ;;  %v186_v17 = vld [vmem:[%s171_s24 + $0x18] sm:$0xff]  ;;  %v183_v18 = vld [vmem:[%s171_s24] sm:$0xff] }
  0x10   : > { %v288_v11 = vsub.f32 %v187_v6, %v767_v7  ;;  %v199_v22 = vsel %vm191_vm0, %v185_v16, 0  ;;  %v184_v23 = vld [vmem:[%s171_s24 + $0x8] sm:$0xff]  ;;  %v202_v25 = vsel %vm191_vm0, %v186_v17, 0  ;;  %v193_v26 = vsel %vm191_vm0, %v183_v18, 0 }
  0x11   : > { %v271_v12 = vand.u32 4294901760, %v270_v8  ;;  %655 = vmatpush.msra.mxu2 %v760_v4  ;;  %v277_v13 = vand.u32 4294901760, %v276_v9  ;;  %v283_v14 = vand.u32 4294901760, %v282_v10  ;;  %219 = vmatpush.msra.mxu0 %v760_v4  ;;  %v786_v24 = vand.u32 4294901760, %v199_v22 }
  0x12   : > { %v289_v15 = vand.u32 4294901760, %v288_v11  ;;  %v791_v30 = vand.u32 4294901760, %v202_v25  ;;  %v224_v32 = vand.u32 4294901760, %v193_v26  ;;  %v196_v33 = vsel %vm191_vm0, %v184_v23, 0 }
  0x13   : > { %v272_v19 = vsub.f32 %v270_v8, %v271_v12  ;;  %v278_v20 = vsub.f32 %v276_v9, %v277_v13  ;;  %656 = vmatpush.msra.mxu2 %v762_v5  ;;  %v284_v21 = vsub.f32 %v282_v10, %v283_v14  ;;  %221 = vmatpush.msra.mxu0 %v762_v5  ;;  %v232_v36 = vand.u32 4294901760, %v196_v33 }
  0x14   : > { %v290_v29 = vsub.f32 %v288_v11, %v289_v15  ;;  %v241_v31 = vsub.f32 %v199_v22, %v786_v24  ;;  %v249_v35 = vsub.f32 %v202_v25, %v791_v30  ;;  %v225_v38 = vsub.f32 %v193_v26, %v224_v32 }
  0x15   : > { %v273_v27 = vand.u32 4294901760, %v272_v19  ;;  %v279_v28 = vand.u32 4294901760, %v278_v20  ;;  %657 = vmatpush.msra.mxu2 %v767_v7  ;;  %223 = vmatpush.msra.mxu0 %v767_v7  ;;  %v285_v34 = vand.u32 4294901760, %v284_v21  ;;  %v233_v40 = vsub.f32 %v196_v33, %v232_v36 }
  0x16   : > { %v242_v37 = vand.u32 4294901760, %v241_v31  ;;  %v291_v39 = vand.u32 4294901760, %v290_v29  ;;  %v250_v42 = vand.u32 4294901760, %v249_v35  ;;  %v226_v43 = vand.u32 4294901760, %v225_v38 }
  0x17   : > { %324 = vmatpush.msrb.mxu2 %v270_v8  ;;  %415 = vmatpush.msrb.mxu0 %v271_v12  ;;  %v234_v46 = vand.u32 4294901760, %v233_v40 }
  0x18   : > { %658 = vmatpush.msra.mxu3 %v273_v27  ;;  %274 = vmatpush.msra.mxu1 %v273_v27  ;;  %v243_v41 = vsub.f32 %v241_v31, %v242_v37  ;;  %v227_v45 = vsub.f32 %v225_v38, %v226_v43  ;;  %v251_v47 = vsub.f32 %v249_v35, %v250_v42 }
  0x19   : > { %327 = vmatpush.msrb.mxu2 %v276_v9  ;;  %419 = vmatpush.msrb.mxu0 %v277_v13  ;;  %v235_v49 = vsub.f32 %v233_v40, %v234_v46 }
  0x1a   : > { %659 = vmatpush.msra.mxu3 %v279_v28  ;;  %280 = vmatpush.msra.mxu1 %v279_v28  ;;  %v244_v44 = vand.u32 4294901760, %v243_v41  ;;  %v228_v48 = vand.u32 4294901760, %v227_v45  ;;  %v252_v50 = vand.u32 4294901760, %v251_v47 }
  0x1b   : > { %330 = vmatpush.msrb.mxu2 %v282_v10  ;;  %423 = vmatpush.msrb.mxu0 %v283_v14  ;;  %v236_v51 = vand.u32 4294901760, %v235_v49 }
  0x1c   : > { %660 = vmatpush.msra.mxu3 %v285_v34  ;;  %286 = vmatpush.msra.mxu1 %v285_v34 }
  0x1d   : > { %333 = vmatpush.msrb.mxu2 %v288_v11  ;;  %427 = vmatpush.msrb.mxu0 %v289_v15 }
  0x1e   : > { %661 = vmatpush.msra.mxu3 %v291_v39  ;;  %292 = vmatpush.msra.mxu1 %v291_v39 }
  0x1f   : > { %245 = vmatmul.f32.vlgmr.msra.gmra.mxu2 %v244_v44  ;;  %302 = vmatmul.f32.vlgmr.msra.gmra.mxu3 %v786_v24 }
  0x20   : > { %368 = vmatpush.msrb.mxu3 %v758_v3  ;;  %294 = vmatmul.f32.vlgmr.msra.gmra.mxu1 %v224_v32 }
  0x21   : > { %229 = vmatmul.f32.vlgmr.msra.gmra.mxu0 %v228_v48  ;;  %458 = vmatpush.msrb.mxu1 %v758_v3 }
  0x22   : > { %370 = vmatpush.msrb.mxu3 %v760_v4 }
  0x23   : > { %460 = vmatpush.msrb.mxu1 %v760_v4 }
  0x24   : > { %372 = vmatpush.msrb.mxu3 %v762_v5 }
  0x25   : > { %462 = vmatpush.msrb.mxu1 %v762_v5 }
  0x26   : > { %374 = vmatpush.msrb.mxu3 %v767_v7 }
  0x27   : > { %253 = vmatmul.f32.gmra.mxu2 %v252_v50  ;;  %306 = vmatmul.f32.gmra.mxu3 %v791_v30 }
  0x28   : > { %298 = vmatmul.f32.gmra.mxu1 %v232_v36 }
  0x29   : > { %237 = vmatmul.f32.gmra.mxu0 %v236_v51  ;;  %464 = vmatpush.msrb.mxu1 %v767_v7 }
  0x2f   : > { %336 = vmatmul.f32.vlgmr.msrb.gmra.mxu2 %v225_v38  ;;  %378 = vmatmul.f32.vlgmr.msrb.gmra.mxu3 %v226_v43 }
  0x30   : > { %466 = vmatmul.f32.vlgmr.msrb.gmra.mxu1 %v224_v32 }
  0x31   : > { %429 = vmatmul.f32.vlgmr.msrb.gmra.mxu0 %v224_v32 }
  0x37   : > { %341 = vmatmul.f32.gmra.mxu2 %v233_v40  ;;  %384 = vmatmul.f32.gmra.mxu3 %v234_v46 }
  0x38   : > { %470 = vmatmul.f32.gmra.mxu1 %v232_v36 }
  0x39   : > { %433 = vmatmul.f32.gmra.mxu0 %v232_v36 }
  0x3f   : > { %346 = vmatmul.f32.gmra.mxu2 %v241_v31  ;;  %390 = vmatmul.f32.gmra.mxu3 %v242_v37 }
  0x40   : > { %474 = vmatmul.f32.gmra.mxu1 %v786_v24 }
  0x41   : > { %437 = vmatmul.f32.gmra.mxu0 %v786_v24 }
  0x47   : > { %351 = vmatmul.f32.gmra.mxu2 %v249_v35  ;;  %396 = vmatmul.f32.gmra.mxu3 %v250_v42 }
  0x48   : > { %478 = vmatmul.f32.gmra.mxu1 %v791_v30 }
  0x49   : > { %441 = vmatmul.f32.gmra.mxu0 %v791_v30 }
  0x9d   : > { %v295_v52 = vpop.f32.mrf.mxu1 }
  0x9e   : > { %v230_v53 = vpop.f32.mrf.mxu0 }
  0x9f   : > { %v296_v62 = vadd.f32 %v295_v52, %v230_v53 }
  0xa2   : > { %v246_v54 = vpop.f32.mrf.mxu2  ;;  %v303_v55 = vpop.f32.mrf.mxu3 }
  0xa3   : > { %v304_v13 = vadd.f32 %v303_v55, %v246_v54 }
  0xa5   : > { %v299_v57 = vpop.f32.mrf.mxu1 }
  0xa6   : > { %v238_v56 = vpop.f32.mrf.mxu0 }
  0xa7   : > { %v300_v5 = vadd.f32 %v299_v57, %v238_v56 }
  0xaa   : > { %v254_v58 = vpop.f32.mrf.mxu2  ;;  %v307_v59 = vpop.f32.mrf.mxu3 }
  0xab   : > { %v308_v22 = vadd.f32 %v307_v59, %v254_v58 }
  0xad   : > { %v467_v61 = vpop.f32.mrf.mxu1 }
  0xae   : > { %v430_v60 = vpop.f32.mrf.mxu0 }
  0xb2   : > { %v337_v63 = vpop.f32.mrf.mxu2  ;;  %v379_v0 = vpop.f32.mrf.mxu3 }
  0xb3   : > { %v338_v1 = vadd.f32 %v337_v63, %v296_v62 }
  0xb5   : > { %v380_v2 = vadd.f32 %v379_v0, %v338_v1  ;;  %v471_v7 = vpop.f32.mrf.mxu1 }
  0xb6   : > { %v434_v4 = vpop.f32.mrf.mxu0 }
  0xb7   : > { %v431_v3 = vadd.f32 %v430_v60, %v380_v2 }
  0xb9   : > { %v468_v6 = vadd.f32 %v467_v61, %v431_v3 }
  0xba   : > { %v342_v8 = vpop.f32.mrf.mxu2  ;;  %v385_v9 = vpop.f32.mrf.mxu3 }
  0xbb   : > { %483 = vst.msk [vmem:[%s815_s28] sm:$0xff] %vm482_vm1, %v468_v6  ;;  %v343_v10 = vadd.f32 %v342_v8, %v300_v5  ;;  %508 = vrot.lane.b32.xlu2 %v468_v6, %s713_s29  ;;  %491 = vrot.lane.b32.xlu0 %v468_v6, %s714_s30 }
  0xbd   : > { %v386_v11 = vadd.f32 %v385_v9, %v343_v10  ;;  %v475_v19 = vpop.f32.mrf.mxu1 }
  0xbe   : > { %v438_v15 = vpop.f32.mrf.mxu0 }
  0xbf   : > { %v435_v12 = vadd.f32 %v434_v4, %v386_v11 }
  0xc1   : > { %v472_v14 = vadd.f32 %v471_v7, %v435_v12 }
  0xc2   : > { %v347_v16 = vpop.f32.mrf.mxu2  ;;  %v391_v17 = vpop.f32.mrf.mxu3 }
  0xc3   : > { %484 = vst.msk [vmem:[%s815_s28 + $0x8] sm:$0xff] %vm482_vm1, %v472_v14  ;;  %v348_v18 = vadd.f32 %v347_v16, %v304_v13  ;;  %525 = vrot.lane.b32.xlu2 %v468_v6, %s715_s3  ;;  %493 = vrot.lane.b32.xlu0 %v472_v14, %s714_s30 }
  0xc5   : > { %v392_v20 = vadd.f32 %v391_v17, %v348_v18  ;;  %v479_v29 = vpop.f32.mrf.mxu1 }
  0xc6   : > { %v442_v27 = vpop.f32.mrf.mxu0 }
  0xc7   : > { %v439_v21 = vadd.f32 %v438_v15, %v392_v20 }
  0xc9   : > { %v476_v23 = vadd.f32 %v475_v19, %v439_v21 }
  0xca   : > { %v352_v24 = vpop.f32.mrf.mxu2  ;;  %v397_v25 = vpop.f32.mrf.mxu3 }
  0xcb   : > { %485 = vst.msk [vmem:[%s815_s28 + $0x10] sm:$0xff] %vm482_vm1, %v476_v23  ;;  %v353_v26 = vadd.f32 %v352_v24, %v308_v22  ;;  %495 = vrot.lane.b32.xlu1 %v476_v23, %s714_s30  ;;  %510 = vrot.lane.b32.xlu2 %v472_v14, %s713_s29 }
  0xcc   : > { %512 = vrot.lane.b32.xlu0 %v476_v23, %s713_s29 }
  0xcd   : > { %v398_v28 = vadd.f32 %v397_v25, %v353_v26 }
  0xcf   : > { %v443_v30 = vadd.f32 %v442_v27, %v398_v28 }
  0xd1   : > { %v480_v31 = vadd.f32 %v479_v29, %v443_v30 }
  0xd3   : > { %486 = vst.msk [vmem:[%s815_s28 + $0x18] sm:$0xff] %vm482_vm1, %v480_v31  ;;  %497 = vrot.lane.b32.xlu1 %v480_v31, %s714_s30  ;;  %531 = vrot.lane.b32.xlu2 %v480_v31, %s715_s3 }
  0xd4   : > { %527 = vrot.lane.b32.xlu0 %v472_v14, %s715_s3 }
  0xdb   : > { %514 = vrot.lane.b32.xlu1 %v480_v31, %s713_s29 }
  0xe3   : > { %529 = vrot.lane.b32.xlu1 %v476_v23, %s715_s3 }
 0x115   : > { %v509_v32 = vpop.permute.xlu2 %508 }
 0x116   : > { %642 = vst.msk [vmem:[%s815_s28 + $0x40] sm:$0xff] %vm482_vm1, %v509_v32 }
 0x11d   : > { %v526_v33 = vpop.permute.xlu2 %525 }
 0x11e   : > { %646 = vst.msk [vmem:[%s815_s28 + $0x60] sm:$0xff] %vm482_vm1, %v526_v33 }
 0x125   : > { %v511_v34 = vpop.permute.xlu2 %510 }
 0x126   : > { %643 = vst.msk [vmem:[%s815_s28 + $0x48] sm:$0xff] %vm482_vm1, %v511_v34 }
 0x12d   : > { %v492_v35 = vpop.permute.xlu0 %491  ;;  %v532_v36 = vpop.permute.xlu2 %531 }
 0x12e   : > { %638 = vst.msk [vmem:[%s815_s28 + $0x20] sm:$0xff] %vm482_vm1, %v492_v35 }
 0x12f   : > { %649 = vst.msk [vmem:[%s815_s28 + $0x78] sm:$0xff] %vm482_vm1, %v532_v36 }
 0x135   : > { %v494_v37 = vpop.permute.xlu0 %493 }
 0x136   : > { %639 = vst.msk [vmem:[%s815_s28 + $0x28] sm:$0xff] %vm482_vm1, %v494_v37 }
 0x13d   : > { %v496_v38 = vpop.permute.xlu1 %495 }
 0x13e   : > { %640 = vst.msk [vmem:[%s815_s28 + $0x30] sm:$0xff] %vm482_vm1, %v496_v38  ;;  %v513_v39 = vpop.permute.xlu0 %512 }
 0x13f   : > { %644 = vst.msk [vmem:[%s815_s28 + $0x50] sm:$0xff] %vm482_vm1, %v513_v39 }
 0x145   : > { %v498_v40 = vpop.permute.xlu1 %497 }
 0x146   : > { %641 = vst.msk [vmem:[%s815_s28 + $0x38] sm:$0xff] %vm482_vm1, %v498_v40  ;;  %v528_v41 = vpop.permute.xlu0 %527 }
 0x147   : > { %647 = vst.msk [vmem:[%s815_s28 + $0x68] sm:$0xff] %vm482_vm1, %v528_v41 }
 0x14d   : > { %v515_v42 = vpop.permute.xlu1 %514 }
 0x14e   : > { %645 = vst.msk [vmem:[%s815_s28 + $0x58] sm:$0xff] %vm482_vm1, %v515_v42 }
 0x155   : > { %v530_v43 = vpop.permute.xlu1 %529 }
 0x156   : > { %648 = vst.msk [vmem:[%s815_s28 + $0x70] sm:$0xff] %vm482_vm1, %v530_v43 }
 0x157 PF: > { %s12_s11 = sadd.s32 1, %s711_s11   ;;  %s869_s9 = smov %s707_s10 }
 0x158   : > { %p9_p5 = scmp.ge.s32.totalorder %s12_s11, 4   ;;  %s870_s10 = smov %s872_s12 }
 0x15a   :  { %11 = sbr.rel (!%p9_p5) target bundleno = 2 (0x2), region = 61 }

</bundles_post_ra>
